<compile_context>
chip_gen: v7x
topology: tpu7x:2x2x1
jax: 0.10.0
libtpu: 0.0.40
codegen_flags: <defaults>
</compile_context>

<pallas_src>
import functools

import jax
import jax.numpy as jnp
from jax.experimental import pallas as pl
from jax.experimental.pallas import tpu as pltpu

NUM_DOCS = 10
NUM_CHUNKS = 4
HIDDEN = 128          # demo size; bert-base would be 768
NUM_LABELS = 2
LANE = 128            # TPU lane width; classifier padded to this many output columns

_INPUT_BLOCK_BUDGET = 12 << 20   # per-buffer byte budget for the dominant [TILE_D, C*H] block


def mean_pool_classify_kernel(x_ref, w_ref, b_ref, out_ref):
    """Fused chunk-mean pooling + linear classifier for one tile of documents.

    x_ref:   [TILE_D, C*H]   per-chunk pooled outputs, chunks flattened into K (native dtype)
    w_ref:   [C*H, L_PAD]    classifier weight: (W^T / C) tiled C times along K
    b_ref:   [1, L_PAD]      classifier bias, lane-padded (f32)
    out_ref: [TILE_D, L_PAD] lane-dense logits (cols >= num_labels: zero weight + zero bias)

    A single MXU matmul performs both the chunk-sum reduction and the classifier
    projection; accumulation is f32 regardless of the input dtype.
    """
    out_ref[...] = (
        jnp.dot(x_ref[...], w_ref[...], preferred_element_type=jnp.float32)
        + b_ref[...]
    )


def prepare_classifier_params(w_cls, b_cls, num_chunks, l_pad=LANE,
                              param_dtype=jnp.float32):
    """One-time (outside the hot path) prep of nn.Linear(hidden, num_labels) params.

    w_cls: [L, H] (PyTorch nn.Linear layout), b_cls: [L].
    Returns:
      w_rep [num_chunks*H, l_pad]: W^T scaled by 1/num_chunks, tiled num_chunks times
            along K, zero-padded on the label axis, cast to `param_dtype` (match the
            pooled-output dtype so the MXU sees a homogeneous matmul, no in-kernel cast).
      b_pad [1, l_pad]: bias zero-padded on the label axis (kept f32; added post-matmul).
    """
    w = jnp.asarray(w_cls, dtype=jnp.float32)
    b = jnp.asarray(b_cls, dtype=jnp.float32)
    L, H = w.shape
    assert L <= l_pad
    wt_scaled = jnp.tile(w.T / num_chunks, (num_chunks, 1))            # [C*H, L]
    w_rep = jnp.zeros((num_chunks * H, l_pad), jnp.float32).at[:, :L].set(wt_scaled)
    b_pad = jnp.zeros((1, l_pad), jnp.float32).at[0, :L].set(b)
    return w_rep.astype(param_dtype), b_pad


def _round_up(x, m):
    return ((x + m - 1) // m) * m


def _pick_tile_d(num_docs, k, itemsize, requested):
    """Docs per grid step: multiple of 8, within the VMEM block budget, and yielding
    >= 2 grid steps when num_docs allows (so v7x's two TensorCores both get work)."""
    cap_vmem = max(8, (_INPUT_BLOCK_BUDGET // (k * itemsize)) // 8 * 8)
    cap_two_steps = _round_up(pl.cdiv(num_docs, 2), 8)
    return max(8, min(_round_up(requested, 8), cap_vmem, cap_two_steps))


@functools.partial(jax.jit, static_argnames=("num_labels", "tile_d"))
def bert_mean_pooling_forward(pooled_outputs, w_rep, b_pad, *,
                              num_labels=NUM_LABELS, tile_d=None):
    """pooled_outputs: [D, C, H] (f32 or bf16, streamed in its native dtype);
    w_rep: [C*H, L_PAD]; b_pad: [1, L_PAD] (from prepare_classifier_params)."""
    D, C, H = pooled_outputs.shape
    K = C * H
    L_pad = w_rep.shape[1]

    x = pooled_outputs.reshape(D, K)                 # row-major view, no HBM copy

    itemsize = jnp.dtype(x.dtype).itemsize
    requested = tile_d if tile_d is not None else (1024 if itemsize <= 2 else 512)
    tile_d_eff = _pick_tile_d(D, K, itemsize, requested)
    grid = (pl.cdiv(D, tile_d_eff),)                 # ragged tail block handled by Pallas

    # Explicit VMEM budget: double-buffered input/output blocks + weight/bias buffers
    # + slack (v5e scoped default is only 16 MiB; v7x physical VMEM is 64 MiB).
    in_block = tile_d_eff * K * itemsize
    out_block = tile_d_eff * L_pad * 4
    w_bytes = K * L_pad * jnp.dtype(w_rep.dtype).itemsize
    b_bytes = L_pad * 4
    vmem_bytes = 2 * (in_block + out_block + w_bytes + b_bytes) + (2 << 20)
    vmem_limit = int(min(max(vmem_bytes, 16 << 20), 64 << 20))

    out = pl.pallas_call(
        mean_pool_classify_kernel,
        out_shape=jax.ShapeDtypeStruct((D, L_pad), jnp.float32),
        grid=grid,
        in_specs=[
            pl.BlockSpec((tile_d_eff, K), lambda i: (i, 0)),   # dominant streamed block
            pl.BlockSpec((K, L_pad), lambda i: (0, 0)),        # VMEM-resident weight
            pl.BlockSpec((1, L_pad), lambda i: (0, 0)),        # VMEM-resident bias
        ],
        out_specs=pl.BlockSpec((tile_d_eff, L_pad), lambda i: (i, 0)),
        compiler_params=pltpu.CompilerParams(
            dimension_semantics=("parallel",),
            vmem_limit_bytes=vmem_limit),
    )(x, w_rep, b_pad)

    return out[:, :num_labels]      # drop padded label lanes only (no doc-axis padding)


def _reference(pooled_outputs, w_cls, b_cls):
    doc_repr = jnp.mean(pooled_outputs.astype(jnp.float32), axis=1)   # [D, H]
    return doc_repr @ w_cls.T + b_cls                                  # [D, L]


if __name__ == "__main__":
    key = jax.random.PRNGKey(0)
    k_pool, k_w, k_b = jax.random.split(key, 3)

    # Stand-in for bert_op[1] per chunk per document (deterministic, synthetic).
    pooled_outputs = jax.random.normal(
        k_pool, (NUM_DOCS, NUM_CHUNKS, HIDDEN), dtype=jnp.float32)

    # Deterministic classifier parameters (nn.Linear(hidden, num_labels) layout).
    w_cls = 0.02 * jax.random.normal(k_w, (NUM_LABELS, HIDDEN), dtype=jnp.float32)
    b_cls = 0.01 * jax.random.normal(k_b, (NUM_LABELS,), dtype=jnp.float32)

    ref = _reference(pooled_outputs, w_cls, b_cls)

    # ---- f32 path ----
    w_rep, b_pad = prepare_classifier_params(w_cls, b_cls, NUM_CHUNKS)
    logits = bert_mean_pooling_forward(pooled_outputs, w_rep, b_pad,
                                       num_labels=NUM_LABELS)
    logits = jax.block_until_ready(logits)
    assert logits.shape == (NUM_DOCS, NUM_LABELS)
    assert jnp.allclose(logits, ref, atol=1e-4, rtol=1e-4), (logits, ref)

    # ---- bf16 path (halves HBM bytes of the bandwidth-bound pooled-output stream) ----
    pooled_bf16 = pooled_outputs.astype(jnp.bfloat16)
    w_rep_b, b_pad_b = prepare_classifier_params(
        w_cls, b_cls, NUM_CHUNKS, param_dtype=jnp.bfloat16)
    logits_bf16 = bert_mean_pooling_forward(pooled_bf16, w_rep_b, b_pad_b,
                                            num_labels=NUM_LABELS)
    logits_bf16 = jax.block_until_ready(logits_bf16)
    assert logits_bf16.shape == (NUM_DOCS, NUM_LABELS)
    assert jnp.allclose(logits_bf16, ref, atol=5e-2, rtol=5e-2), (logits_bf16, ref)

    print("KERNEL_OK")
</pallas_src>

<mosaic_0001>
module attributes {stable_mosaic.version = 11 : i64} {
  func.func @mean_pool_classify_kernel(%arg0: i32, %arg1: memref<8x512xf32, #tpu.memory_space<vmem>>, %arg2: memref<512x128xf32, #tpu.memory_space<vmem>>, %arg3: memref<1x128xf32, #tpu.memory_space<vmem>>, %arg4: memref<8x128xf32, #tpu.memory_space<vmem>>) attributes {dimension_semantics = [#tpu.dimension_semantics<parallel>], iteration_bounds = array<i64: 2>, scalar_prefetch = 0 : i64, scratch_operands = 0 : i64, tpu.core_type = #tpu.core_type<tc>, window_params = [{transform_indices = @transform_0, window_bounds = array<i64: 8, 512>}, {pipeline_mode = #tpu.pipeline_mode<synchronous>, transform_indices = @transform_1, window_bounds = array<i64: 512, 128>}, {pipeline_mode = #tpu.pipeline_mode<synchronous>, transform_indices = @transform_2, window_bounds = array<i64: 1, 128>}, {transform_indices = @transform_3, window_bounds = array<i64: 8, 128>}]} {
    %c0 = arith.constant 0 : index
    %c0_0 = arith.constant 0 : index
    %0 = vector.load %arg1[%c0, %c0_0] : memref<8x512xf32, #tpu.memory_space<vmem>>, vector<8x512xf32>
    %c0_1 = arith.constant 0 : index
    %c0_2 = arith.constant 0 : index
    %1 = vector.load %arg2[%c0_1, %c0_2] : memref<512x128xf32, #tpu.memory_space<vmem>>, vector<512x128xf32>
    %cst = arith.constant dense<0.000000e+00> : vector<8x128xf32>
    %2 = tpu.matmul %0, %1, %cst {dimension_numbers = #tpu.dot_dimension_numbers<[1], [0], [0], [1], [0, 0, 1, 1], [], []>} : vector<8x512xf32>, vector<512x128xf32>, vector<8x128xf32> -> vector<8x128xf32>
    %c0_3 = arith.constant 0 : index
    %c0_4 = arith.constant 0 : index
    %3 = vector.load %arg3[%c0_3, %c0_4] : memref<1x128xf32, #tpu.memory_space<vmem>>, vector<1x128xf32>
    %4 = vector.broadcast %3 : vector<1x128xf32> to vector<8x128xf32>
    %5 = arith.addf %2, %4 : vector<8x128xf32>
    %c0_5 = arith.constant 0 : index
    %c0_6 = arith.constant 0 : index
    %6 = vector.load %arg4[%c0_5, %c0_6] : memref<8x128xf32, #tpu.memory_space<vmem>>, vector<8x128xf32>
    tpu.vector_store %arg4[%c0_5, %c0_6], %5 {strides = array<i32>} : memref<8x128xf32, #tpu.memory_space<vmem>>, vector<8x128xf32>,
    return
  }
  func.func @transform_0(%arg0: i32) -> (i32, i32) {
    %c0_i32 = arith.constant 0 : i32
    %c0_i32_0 = arith.constant 0 : i32
    return %arg0, %c0_i32 : i32, i32
  }
  func.func @transform_1(%arg0: i32) -> (i32, i32) {
    %c0_i32 = arith.constant 0 : i32
    %c0_i32_0 = arith.constant 0 : i32
    %c0_i32_1 = arith.constant 0 : i32
    return %c0_i32, %c0_i32_0 : i32, i32
  }
  func.func @transform_2(%arg0: i32) -> (i32, i32) {
    %c0_i32 = arith.constant 0 : i32
    %c0_i32_0 = arith.constant 0 : i32
    %c0_i32_1 = arith.constant 0 : i32
    return %c0_i32, %c0_i32_0 : i32, i32
  }
  func.func @transform_3(%arg0: i32) -> (i32, i32) {
    %c0_i32 = arith.constant 0 : i32
    %c0_i32_0 = arith.constant 0 : i32
    return %arg0, %c0_i32 : i32, i32
  }
}

</mosaic_0001>

<bundles_post_ra>
// kernel: bert_mean_pooling_forward.1
= control target key start
LH: loop header
LB: loop body
LE: loop exit
PB: predicated region body
PF: predicated region fallthrough
CT: control target
= control target key end

     0   :  { %8 = vsyncpa [#allocation3], 0  ;;  %s697_s12 = smov 0   ;;  %s768_s0 = inlined_call_operand.vmem [shape: f32[10,512], index: 0, kind: input, shape index: {}]   ;;  %s769_s1 = inlined_call_operand.hbm [shape: f32[512,128], index: 1, kind: input, shape index: {}]   ;;  %s770_s2 = inlined_call_operand.vmem [shape: f32[1,128], index: 2, kind: input, shape index: {}]   ;;  %s771_s3 = inlined_call_operand.vmem [shape: f32[10,128], index: 3, kind: output, shape index: {}]  }
   0x1 LB: > { %s703_s13 = sadd.s32 4294967295, %s672_s12   ;;  %p467_p0 = scmp.ge.s32.totalorder %s672_s12, 1  ;;  %s672_s12 = sphi %s697_s12, %s14_s12  }
   0x2   : > { %p113_p1 = scmp.lt.s32.totalorder %s672_s12, 3  ;;  %s674_s14 = smov [#allocation2]  }
   0x3   : > { %s125_s15 = sshll.u32 %s674_s14, 4  ;;  %p772_p3 = scmp.eq.s32.totalorder %s703_s13, 0  ;;  %s126_s15 = int_to_ptr.vmem [resolvable:$true] %s125_s15 }
   0x4   : > { %p707_p2 = pnand %p467_p0, %p113_p1  ;;  %s634_s20 = scalar_lea.hbm %s769_s1, 8192 }
   0x5   : > { %p635_p6 = scmp.ne.s32.totalorder %s769_s1, %s634_s20  ;;  %p641_p10 = scmp.lt.u32.totalorder %s634_s20, %s769_s1 }
   0x6   : > { %s774_s16 = scalar_select %p707_p2, 1, 0 }
   0x7   : > { %p617_p4 = pneg %p707_p2 }
   0x9   : > { %p716_p5 = pnand %p772_p3, %p617_p4 }
   0xb   : > { %p636_p7 = pneg %p716_p5 }
   0xd   : > { %p637_p8 = pnand %p636_p7, %p635_p6 }
   0xf   : > { %p638_p9 = pneg %p637_p8 }
  0x11   : > { %p643_p11 = pnand %p641_p10, %p638_p9 }
  0x13   : > { %646 = shalt.err (!%p643_p11)
}
  0x14   : > { %s647_s25 = scalar_lea.vmem %s126_s15, 8192  ;;  %p655_p1 = scmp.lt.s32.totalorder %s126_s15, %s126_s15 }
  0x15   : > { %p648_p12 = scmp.ne.s32.totalorder %s126_s15, %s647_s25  ;;  %p656_p4 = scmp.lt.s32.totalorder %s647_s25, %s647_s25 }
  0x17   : > { %p650_p13 = pnand %p648_p12, %p636_p7  ;;  %p657_p3 = por %p656_p4, %p655_p1 }
  0x19   : > { %p651_p0 = pneg %p650_p13 }
  0x1b   : > { %p658_p2 = pnand %p657_p3, %p651_p0 }
  0x1d   : > { %661 = shalt.err (!%p658_p2)
}
  0x1e   : > { %s675_s26 = smov 128   ;;  %s676_s27 = smov 8  }
  0x1f   : > { %620 = dma.hbm_to_vmem [thread:$0]  (!%p716_p5), %s769_s1, 8192, %s126_s15, [#allocation3], %s675_s26, %s675_s26, %s676_s27  }
  0x20   : > { %p776_p6 = scmp.ne.s32.totalorder %s774_s16, 0 }
  0x21   : > { %p777_p8 = scmp.eq.s32.totalorder (!%p776_p6), %s703_s13, 0 }
  0x22   : > { %152 = sbr.rel (%p776_p6) target bundleno = 297 (0x129), region = 32 }
  0x29   : > { %667 = dma.done.wait (%p777_p8), [#allocation3], 8192   ;;  %p778_p7 = pmov %p777_p8 }
  0x2a   : > { %v204_v0 = vld [vmem:[#allocation2 + $0x80] sm:$0xff]  ;;  %v205_v1 = vld [vmem:[#allocation2 + $0x88] sm:$0xff]  ;;  %v206_v11 = vld [vmem:[#allocation2 + $0x90] sm:$0xff]  ;;  %p175_p2 = scmp.lt.s32.totalorder %s703_s13, 1 }
  0x2b   : > { %669 = vsyncadd (%p778_p7), [#allocation3], 4294959104  ;;  %v188_v2 = vld [vmem:[#allocation2] sm:$0xff]  ;;  %v549_v3 = vpack.c.bf16 %v205_v1, %v204_v0  ;;  %v189_v4 = vld [vmem:[#allocation2 + $0x8] sm:$0xff] }
  0x2c   : > { %v236_v5 = vld [vmem:[#allocation2 + $0x180] sm:$0xff]  ;;  %v237_v6 = vld [vmem:[#allocation2 + $0x188] sm:$0xff]  ;;  %v551_v7 = vpack.c.bf16 %v189_v4, %v188_v2  ;;  %v207_v13 = vld [vmem:[#allocation2 + $0x98] sm:$0xff]  ;;  %s780_s13 = smov (!%p175_p2, %s703_s13), 1 }
  0x2d   : > { %v581_v8 = vpack.c.bf16 %v237_v6, %v236_v5  ;;  %v220_v9 = vld [vmem:[#allocation2 + $0x100] sm:$0xff]  ;;  %v221_v10 = vld [vmem:[#allocation2 + $0x108] sm:$0xff]  ;;  %550 = vmatprep.subr.bf16.mxu0 %v549_v3  ;;  %v190_v14 = vld [vmem:[#allocation2 + $0x10] sm:$0xff]  ;;  %v553_v16 = vpack.c.bf16 %v207_v13, %v206_v11  ;;  %s478_s30 = sshll.u32 %s780_s13, 5  ;;  %s474_s9 = sshll.u32 %s780_s13, 3 }
  0x2e   : > { %v583_v12 = vpack.c.bf16 %v221_v10, %v220_v9  ;;  %v191_v15 = vld [vmem:[#allocation2 + $0x18] sm:$0xff]  ;;  %552 = vmatpush3.bf16.msra.mxu0 %v551_v7  ;;  %v238_v18 = vld [vmem:[#allocation2 + $0x190] sm:$0xff]  ;;  %v208_v23 = vld [vmem:[#allocation2 + $0xa0] sm:$0xff]  ;;  %s752_s6 = scalar_lea.vmem %s768_s0, %s478_s30  ;;  %s183_s14 = scalar_lea.vmem %s771_s3, %s474_s9 }
  0x2f   : > { %582 = vmatprep.subr.bf16.mxu1 %v581_v8  ;;  %v555_v17 = vpack.c.bf16 %v191_v15, %v190_v14  ;;  %v239_v19 = vld [vmem:[#allocation2 + $0x198] sm:$0xff]  ;;  %v222_v20 = vld [vmem:[#allocation2 + $0x110] sm:$0xff]  ;;  %v209_v24 = vld [vmem:[#allocation2 + $0xa8] sm:$0xff]  ;;  %554 = vmatprep.subr.bf16.mxu0 %v553_v16 }
  0x30   : > { %584 = vmatpush3.bf16.msra.mxu1 %v583_v12  ;;  %v585_v21 = vpack.c.bf16 %v239_v19, %v238_v18  ;;  %v223_v22 = vld [vmem:[#allocation2 + $0x118] sm:$0xff]  ;;  %v557_v26 = vpack.c.bf16 %v209_v24, %v208_v23  ;;  %v192_v27 = vld [vmem:[#allocation2 + $0x20] sm:$0xff]  ;;  %v193_v28 = vld [vmem:[#allocation2 + $0x28] sm:$0xff] }
  0x31   : > { %v587_v25 = vpack.c.bf16 %v223_v22, %v222_v20  ;;  %v240_v29 = vld [vmem:[#allocation2 + $0x1a0] sm:$0xff]  ;;  %v241_v30 = vld [vmem:[#allocation2 + $0x1a8] sm:$0xff]  ;;  %v559_v33 = vpack.c.bf16 %v193_v28, %v192_v27  ;;  %v210_v35 = vld [vmem:[#allocation2 + $0xb0] sm:$0xff] }
  0x32   : > { %586 = vmatprep.subr.bf16.mxu1 %v585_v21  ;;  %v224_v31 = vld [vmem:[#allocation2 + $0x120] sm:$0xff]  ;;  %v225_v32 = vld [vmem:[#allocation2 + $0x128] sm:$0xff]  ;;  %556 = vmatpush3.bf16.msra.mxu0 %v555_v17  ;;  %v589_v34 = vpack.c.bf16 %v241_v30, %v240_v29  ;;  %v211_v36 = vld [vmem:[#allocation2 + $0xb8] sm:$0xff] }
  0x33   : > { %v194_v37 = vld [vmem:[#allocation2 + $0x30] sm:$0xff]  ;;  %558 = vmatprep.subr.bf16.mxu0 %v557_v26  ;;  %v591_v38 = vpack.c.bf16 %v225_v32, %v224_v31  ;;  %v561_v39 = vpack.c.bf16 %v211_v36, %v210_v35  ;;  %v195_v40 = vld [vmem:[#allocation2 + $0x38] sm:$0xff]  ;;  %v212_v46 = vld [vmem:[#allocation2 + $0xc0] sm:$0xff] }
  0x34   : > { %588 = vmatpush3.bf16.msra.mxu1 %v587_v25  ;;  %v242_v41 = vld [vmem:[#allocation2 + $0x1b0] sm:$0xff]  ;;  %v243_v42 = vld [vmem:[#allocation2 + $0x1b8] sm:$0xff]  ;;  %v213_v47 = vld [vmem:[#allocation2 + $0xc8] sm:$0xff]  ;;  %v563_v48 = vpack.c.bf16 %v195_v40, %v194_v37 }
  0x35   : > { %590 = vmatprep.subr.bf16.mxu1 %v589_v34  ;;  %v593_v43 = vpack.c.bf16 %v243_v42, %v242_v41  ;;  %v226_v44 = vld [vmem:[#allocation2 + $0x130] sm:$0xff]  ;;  %v227_v45 = vld [vmem:[#allocation2 + $0x138] sm:$0xff]  ;;  %v244_v49 = vld [vmem:[#allocation2 + $0x1c0] sm:$0xff]  ;;  %v565_v52 = vpack.c.bf16 %v213_v47, %v212_v46 }
  0x36   : > { %560 = vmatpush3.bf16.msra.mxu0 %v559_v33  ;;  %v245_v50 = vld [vmem:[#allocation2 + $0x1c8] sm:$0xff]  ;;  %v595_v51 = vpack.c.bf16 %v227_v45, %v226_v44  ;;  %v196_v53 = vld [vmem:[#allocation2 + $0x40] sm:$0xff]  ;;  %v214_v58 = vld [vmem:[#allocation2 + $0xd0] sm:$0xff] }
  0x37   : > { %562 = vmatprep.subr.bf16.mxu0 %v561_v39  ;;  %v197_v54 = vld [vmem:[#allocation2 + $0x48] sm:$0xff]  ;;  %v228_v55 = vld [vmem:[#allocation2 + $0x140] sm:$0xff]  ;;  %v597_v56 = vpack.c.bf16 %v245_v50, %v244_v49  ;;  %v215_v59 = vld [vmem:[#allocation2 + $0xd8] sm:$0xff] }
  0x38   : > { %592 = vmatpush3.bf16.msra.mxu1 %v591_v38  ;;  %v229_v57 = vld [vmem:[#allocation2 + $0x148] sm:$0xff]  ;;  %v246_v60 = vld [vmem:[#allocation2 + $0x1d0] sm:$0xff]  ;;  %v247_v61 = vld [vmem:[#allocation2 + $0x1d8] sm:$0xff]  ;;  %v567_v62 = vpack.c.bf16 %v197_v54, %v196_v53  ;;  %v569_v0 = vpack.c.bf16 %v215_v59, %v214_v58 }
  0x39   : > { %594 = vmatprep.subr.bf16.mxu1 %v593_v43  ;;  %v599_v63 = vpack.c.bf16 %v229_v57, %v228_v55  ;;  %v198_v1 = vld [vmem:[#allocation2 + $0x50] sm:$0xff]  ;;  %v199_v2 = vld [vmem:[#allocation2 + $0x58] sm:$0xff]  ;;  %v601_v4 = vpack.c.bf16 %v247_v61, %v246_v60  ;;  %v216_v6 = vld [vmem:[#allocation2 + $0xe0] sm:$0xff] }
  0x3a   : > { %564 = vmatpush3.bf16.msra.mxu0 %v563_v48  ;;  %v230_v3 = vld [vmem:[#allocation2 + $0x150] sm:$0xff]  ;;  %v231_v5 = vld [vmem:[#allocation2 + $0x158] sm:$0xff]  ;;  %v217_v7 = vld [vmem:[#allocation2 + $0xe8] sm:$0xff]  ;;  %v571_v10 = vpack.c.bf16 %v199_v2, %v198_v1 }
  0x3b   : > { %566 = vmatprep.subr.bf16.mxu0 %v565_v52  ;;  %v248_v8 = vld [vmem:[#allocation2 + $0x1e0] sm:$0xff]  ;;  %v249_v9 = vld [vmem:[#allocation2 + $0x1e8] sm:$0xff]  ;;  %v603_v13 = vpack.c.bf16 %v231_v5, %v230_v3  ;;  %v573_v14 = vpack.c.bf16 %v217_v7, %v216_v6  ;;  %v218_v19 = vld [vmem:[#allocation2 + $0xf0] sm:$0xff] }
  0x3c   : > { %596 = vmatpush3.bf16.msra.mxu1 %v595_v51  ;;  %v200_v11 = vld [vmem:[#allocation2 + $0x60] sm:$0xff]  ;;  %v201_v12 = vld [vmem:[#allocation2 + $0x68] sm:$0xff]  ;;  %v605_v18 = vpack.c.bf16 %v249_v9, %v248_v8  ;;  %v219_v20 = vld [vmem:[#allocation2 + $0xf8] sm:$0xff] }
  0x3d   : > { %598 = vmatprep.subr.bf16.mxu1 %v597_v56  ;;  %v232_v15 = vld [vmem:[#allocation2 + $0x160] sm:$0xff]  ;;  %v233_v16 = vld [vmem:[#allocation2 + $0x168] sm:$0xff]  ;;  %v187_v21 = vld [vmem:[%s752_s6 + $0x18] sm:$0xff]  ;;  %v575_v24 = vpack.c.bf16 %v201_v12, %v200_v11  ;;  %v577_v26 = vpack.c.bf16 %v219_v20, %v218_v19 }
  0x3e   : > { %568 = vmatpush3.bf16.msra.mxu0 %v567_v62  ;;  %v185_v17 = vld [vmem:[%s752_s6 + $0x8] sm:$0xff]  ;;  %v250_v22 = vld [vmem:[#allocation2 + $0x1f0] sm:$0xff]  ;;  %v251_v23 = vld [vmem:[#allocation2 + $0x1f8] sm:$0xff]  ;;  %393 = vmatprep.mubr.f32.mxu1 %v187_v21  ;;  %v607_v25 = vpack.c.bf16 %v233_v16, %v232_v15 }
  0x3f   : > { %570 = vmatprep.subr.bf16.mxu0 %v569_v0  ;;  %323 = vmatprep.mubr.f32.mxu0 %v185_v17  ;;  %v202_v27 = vld [vmem:[#allocation2 + $0x70] sm:$0xff]  ;;  %v203_v28 = vld [vmem:[#allocation2 + $0x78] sm:$0xff]  ;;  %v609_v29 = vpack.c.bf16 %v251_v23, %v250_v22  ;;  %v184_v34 = vld [vmem:[%s752_s6] sm:$0xff] }
  0x40   : > { %600 = vmatpush3.bf16.msra.mxu1 %v599_v63  ;;  %v234_v30 = vld [vmem:[#allocation2 + $0x170] sm:$0xff]  ;;  %v235_v31 = vld [vmem:[#allocation2 + $0x178] sm:$0xff]  ;;  %v579_v32 = vpack.c.bf16 %v203_v28, %v202_v27  ;;  %v475_v37 = vld [vmem:[%s770_s2] ss:$0 sm:$0xff] }
  0x41   : > { %602 = vmatprep.subr.bf16.mxu1 %v601_v4  ;;  %v611_v33 = vpack.c.bf16 %v235_v31, %v234_v30  ;;  %v186_v35 = vld [vmem:[%s752_s6 + $0x10] sm:$0xff] }
  0x42   : > { %572 = vmatpush3.bf16.msra.mxu0 %v571_v10 }
  0x43   : > { %574 = vmatprep.subr.bf16.mxu0 %v573_v14 }
  0x44   : > { %604 = vmatpush3.bf16.msra.mxu1 %v603_v13 }
  0x45   : > { %606 = vmatprep.subr.bf16.mxu1 %v605_v18 }
  0x46   : > { %576 = vmatpush3.bf16.msra.mxu0 %v575_v24 }
  0x47   : > { %578 = vmatprep.subr.bf16.mxu0 %v577_v26 }
  0x48   : > { %608 = vmatpush3.bf16.msra.mxu1 %v607_v25 }
  0x49   : > { %610 = vmatprep.subr.bf16.mxu1 %v609_v29 }
  0x4a   : > { %580 = vmatpush3.bf16.msra.mxu0 %v579_v32 }
  0x4c   : > { %612 = vmatpush3.bf16.msra.mxu1 %v611_v33 }
  0x4d   : > { %324 = vmatmul.mubr.f32.vlgmr.msra.gmra.mrb[0].mxu0 %v184_v34 }
  0x4f   : > { %394 = vmatmul.mubr.f32.vlgmr.msra.gmra.mrb[0].mxu1 %v186_v35 }
 0x120   : > { %v511_v36 = vpop.f32.mrb[0].mxu0 }
 0x121   : > { %v512_v38 = vpop.f32.mrb[1].mxu0 }
 0x122   : > { %v546_v39 = vpop.f32.mrb[0].mxu1  ;;  %v513_v40 = vadd.f32 %v512_v38, %v511_v36 }
 0x123   : > { %v547_v41 = vpop.f32.mrb[1].mxu1 }
 0x124   : > { %v548_v42 = vadd.f32 %v547_v41, %v546_v39  ;;  %v326_v43 = vadd.f32 %v513_v40, %v475_v37 }
 0x126   : > { %v396_v44 = vadd.f32 %v548_v42, %v326_v43 }
 0x128   : > { %399 = vst [vmem:[%s183_s14] sm:$0xff] %v396_v44 }
 0x129 PF: > { %s14_s12 = sadd.s32 1, %s672_s12  }
 0x12a   : > { %p11_p3 = scmp.ge.s32.totalorder %s14_s12, 4  }
 0x12c   :  { %13 = sbr.rel (!%p11_p3) target bundleno = 1 (0x1), region = 67 }
 0x133   :  { %419 = vsyncpa [#allocation3], 1 }
 0x134   :  { %421 = vsyncpa [#allocation3 + $0x1], 1 }

</bundles_post_ra>
